<compile_context>
chip_gen: v7x
topology: tpu7x:2x2x1
jax: 0.10.0
libtpu: 0.0.40
codegen_flags: <defaults>
</compile_context>

<pallas_src>
import functools

import jax
import jax.numpy as jnp
from jax import lax
from jax.experimental import pallas as pl
from jax.experimental.pallas import tpu as pltpu

LANES = 128
MAX_TM = 4096  # max rows per grid step (multiple of 8); 2 MiB f32 per input block


def _round_up(x: int, m: int) -> int:
    return ((x + m - 1) // m) * m


def _scaled_mse_kernel(yp_ref, yt_ref, o_ref, acc_ref, *, tm, n_valid, needs_mask):
    i = pl.program_id(0)

    @pl.when(i == 0)
    def _init():
        acc_ref[...] = jnp.zeros_like(acc_ref)

    # Simplified math: mse_scaled = 4 * (yt - yp)^2; accumulate d*d, scale later.
    d = yt_ref[...].astype(jnp.float32) - yp_ref[...].astype(jnp.float32)
    sq = d * d

    if needs_mask:
        # Last row-block is ragged: mask by global element index so the
        # unspecified out-of-bounds data (and any pad tail) contributes 0.
        row = lax.broadcasted_iota(jnp.int32, (tm, LANES), 0)
        lane = lax.broadcasted_iota(jnp.int32, (tm, LANES), 1)
        gidx = (i * tm + row) * LANES + lane
        sq = jnp.where(gidx < n_valid, sq, 0.0)

    # Per-step partial sums stay vreg-shaped (VPU-only adds, no XLU per step).
    acc_ref[...] += sq.reshape(tm // 8, 8, LANES).sum(axis=0)

    # One cross-lane/sublane reduce total, at the very last grid step.
    @pl.when(i == pl.num_programs(0) - 1)
    def _finalize():
        o_ref[...] = jnp.sum(acc_ref[...]).reshape(1, 1)


def scaled_mse(y_pred: jax.Array, y_true: jax.Array) -> jax.Array:
    assert y_pred.shape == y_true.shape
    n_elems = int(y_pred.size)

    # Flatten in native dtype (reshape only; no upcast, no full-array copy).
    flat_p = jnp.ravel(y_pred)
    flat_t = jnp.ravel(y_true)

    rows = pl.cdiv(n_elems, LANES)
    padded = rows * LANES
    if padded != n_elems:
        # Minimal tail pad (< 128 elems worth of rows) purely so the flat array
        # reshapes into a lane-dense (rows, 128) slab; padded zeros contribute
        # (0-0)^2 == 0 and are additionally covered by the in-kernel mask.
        flat_p = jnp.pad(flat_p, (0, padded - n_elems))
        flat_t = jnp.pad(flat_t, (0, padded - n_elems))

    x_p = flat_p.reshape(rows, LANES)
    x_t = flat_t.reshape(rows, LANES)

    # Biggest tile that fits comfortably in scoped VMEM on all generations.
    tm = min(MAX_TM, _round_up(rows, 8))
    n_steps = pl.cdiv(rows, tm)
    needs_mask = (rows % tm) != 0  # ragged last block -> must mask

    kernel = functools.partial(
        _scaled_mse_kernel, tm=tm, n_valid=n_elems, needs_mask=needs_mask
    )

    total = pl.pallas_call(
        kernel,
        out_shape=jax.ShapeDtypeStruct((1, 1), jnp.float32),
        grid_spec=pltpu.PrefetchScalarGridSpec(
            num_scalar_prefetch=0,
            grid=(n_steps,),
            in_specs=[
                pl.BlockSpec((tm, LANES), lambda i: (i, 0)),
                pl.BlockSpec((tm, LANES), lambda i: (i, 0)),
            ],
            out_specs=pl.BlockSpec((1, 1), lambda i: (0, 0)),
            scratch_shapes=[pltpu.VMEM((8, LANES), jnp.float32)],
        ),
        compiler_params=pltpu.CompilerParams(
            dimension_semantics=("arbitrary",),
        ),
    )(x_p, x_t)

    # mean(4 * diff^2) == 4 * sum(diff^2) / N
    return (4.0 * total[0, 0] / jnp.float32(n_elems)).astype(jnp.float32)


if __name__ == "__main__":
    key = jax.random.PRNGKey(0)
    k1, k2 = jax.random.split(key)
    shape = (2, 4, 16, 16)  # NCHW, matching the PyTorch module's typical input
    y_pred = jax.random.normal(k1, shape, dtype=jnp.float32)
    y_true = jax.random.normal(k2, shape, dtype=jnp.float32)

    out = jax.block_until_ready(scaled_mse(y_pred, y_true))

    # Reference check against the *original* (unsimplified) PyTorch math.
    diff = jnp.abs(y_true - y_pred)
    max_diff = 1.0 - ((diff <= 0.5) * diff + (diff > 0.5) * diff)
    ref = jnp.mean((1.0 - (max_diff - diff)) ** 2)
    assert jnp.allclose(out, ref, rtol=1e-5, atol=1e-6), (out, ref)

    print("KERNEL_OK")
</pallas_src>

<mosaic_0001>
module attributes {stable_mosaic.version = 11 : i64} {
  func.func @_scaled_mse_kernel(%arg0: i32, %arg1: memref<16x128xf32, #tpu.memory_space<vmem>>, %arg2: memref<16x128xf32, #tpu.memory_space<vmem>>, %arg3: memref<1x1xf32, #tpu.memory_space<vmem>>, %arg4: memref<8x128xf32, #tpu.memory_space<vmem>>) attributes {dimension_semantics = [#tpu.dimension_semantics<arbitrary>], iteration_bounds = array<i64: 1>, scalar_prefetch = 0 : i64, scratch_operands = 1 : i64, tpu.core_type = #tpu.core_type<tc>, window_params = [{transform_indices = @transform_0, window_bounds = array<i64: 16, 128>}, {transform_indices = @transform_1, window_bounds = array<i64: 16, 128>}, {pipeline_mode = #tpu.pipeline_mode<synchronous>, transform_indices = @transform_2, window_bounds = array<i64: 1, 1>}]} {
    %c0_i32 = arith.constant 0 : i32
    %0 = arith.cmpi eq, %arg0, %c0_i32 : i32
    %1 = arith.extui %0 : i1 to i32
    %c0_i32_0 = arith.constant 0 : i32
    %2 = arith.cmpi ne, %1, %c0_i32_0 : i32
    scf.if %2 {
      %cst_10 = arith.constant 0.000000e+00 : f32
      %15 = vector.broadcast %cst_10 : f32 to vector<8x128xf32>
      %c0_11 = arith.constant 0 : index
      %c0_12 = arith.constant 0 : index
      %16 = vector.load %arg4[%c0_11, %c0_12] : memref<8x128xf32, #tpu.memory_space<vmem>>, vector<8x128xf32>
      tpu.vector_store %arg4[%c0_11, %c0_12], %15 {strides = array<i32>} : memref<8x128xf32, #tpu.memory_space<vmem>>, vector<8x128xf32>,
    } else {
    }
    %c0 = arith.constant 0 : index
    %c0_1 = arith.constant 0 : index
    %3 = vector.load %arg2[%c0, %c0_1] : memref<16x128xf32, #tpu.memory_space<vmem>>, vector<16x128xf32>
    %c0_2 = arith.constant 0 : index
    %c0_3 = arith.constant 0 : index
    %4 = vector.load %arg1[%c0_2, %c0_3] : memref<16x128xf32, #tpu.memory_space<vmem>>, vector<16x128xf32>
    %5 = arith.subf %3, %4 : vector<16x128xf32>
    %6 = arith.mulf %5, %5 : vector<16x128xf32>
    %c0_4 = arith.constant 0 : index
    %c0_5 = arith.constant 0 : index
    %7 = vector.load %arg4[%c0_4, %c0_5] : memref<8x128xf32, #tpu.memory_space<vmem>>, vector<8x128xf32>
    %8 = vector.shape_cast %6 : vector<16x128xf32> to vector<2x8x128xf32>
    %cst = arith.constant dense<0.000000e+00> : vector<8x128xf32>
    %9 = vector.multi_reduction <add>, %8, %cst [0] : vector<2x8x128xf32> to vector<8x128xf32>
    %10 = arith.addf %7, %9 : vector<8x128xf32>
    %c0_6 = arith.constant 0 : index
    %c0_7 = arith.constant 0 : index
    %11 = vector.load %arg4[%c0_6, %c0_7] : memref<8x128xf32, #tpu.memory_space<vmem>>, vector<8x128xf32>
    tpu.vector_store %arg4[%c0_6, %c0_7], %10 {strides = array<i32>} : memref<8x128xf32, #tpu.memory_space<vmem>>, vector<8x128xf32>,
    %c0_i32_8 = arith.constant 0 : i32
    %12 = arith.cmpi eq, %arg0, %c0_i32_8 : i32
    %13 = arith.extui %12 : i1 to i32
    %c0_i32_9 = arith.constant 0 : i32
    %14 = arith.cmpi ne, %13, %c0_i32_9 : i32
    scf.if %14 {
      %c0_10 = arith.constant 0 : index
      %c0_11 = arith.constant 0 : index
      %15 = vector.load %arg4[%c0_10, %c0_11] : memref<8x128xf32, #tpu.memory_space<vmem>>, vector<8x128xf32>
      %16 = vector.shape_cast %15 : vector<8x128xf32> to vector<1x8x128xf32>
      %cst_12 = arith.constant dense<0.000000e+00> : vector<1xf32>
      %17 = vector.multi_reduction <add>, %16, %cst_12 [1, 2] : vector<1x8x128xf32> to vector<1xf32>
      %18 = vector.shape_cast %17 : vector<1xf32> to vector<1x1x1xf32>
      %19 = vector.extract %18[0, 0, 0] : f32 from vector<1x1x1xf32>
      %20 = vector.broadcast %19 : f32 to vector<1x1xf32>
      %c0_13 = arith.constant 0 : index
      %c0_14 = arith.constant 0 : index
      %21 = vector.load %arg3[%c0_13, %c0_14] : memref<1x1xf32, #tpu.memory_space<vmem>>, vector<1x1xf32>
      tpu.vector_store %arg3[%c0_13, %c0_14], %20 {strides = array<i32>} : memref<1x1xf32, #tpu.memory_space<vmem>>, vector<1x1xf32>,
    } else {
    }
    return
  }
  func.func @transform_0(%arg0: i32) -> (i32, i32) {
    %c0_i32 = arith.constant 0 : i32
    %c0_i32_0 = arith.constant 0 : i32
    return %arg0, %c0_i32 : i32, i32
  }
  func.func @transform_1(%arg0: i32) -> (i32, i32) {
    %c0_i32 = arith.constant 0 : i32
    %c0_i32_0 = arith.constant 0 : i32
    return %arg0, %c0_i32 : i32, i32
  }
  func.func @transform_2(%arg0: i32) -> (i32, i32) {
    %c0_i32 = arith.constant 0 : i32
    %c0_i32_0 = arith.constant 0 : i32
    %c0_i32_1 = arith.constant 0 : i32
    return %c0_i32, %c0_i32_0 : i32, i32
  }
}

</mosaic_0001>

<bundles_post_ra>
// kernel: tpu_custom_call.1
= control target key start
LH: loop header
LB: loop body
LE: loop exit
PB: predicated region body
PF: predicated region fallthrough
CT: control target
= control target key end

     0   :  { %7 = vsyncpa [#allocation4], 0  ;;  %s224_s0 = inlined_call_operand.hbm [shape: f32[16,128], index: 0, kind: input, shape index: {}]   ;;  %s225_s1 = inlined_call_operand.hbm [shape: f32[16,128], index: 1, kind: input, shape index: {}]   ;;  %s226_s2 = inlined_call_operand.hbm [shape: f32[1,1], index: 2, kind: output, shape index: {}]  }
   0x1   :  { %8 = vsyncpa [#allocation7], 0 }
   0x2   :  { %9 = vsyncpa [#allocation5], 0  ;;  %s168_s9 = smov [#allocation3]   ;;  %s96_s13 = scalar_lea.hbm %s224_s0, 256 }
   0x3   :  { %s15_s10 = sshll.u32 %s168_s9, 4  ;;  %p97_p0 = scmp.ne.s32.totalorder %s224_s0, %s96_s13  ;;  %s16_s10 = int_to_ptr.vmem [resolvable:$true] %s15_s10 }
   0x4   :  { %p100_p1 = scmp.lt.u32.totalorder %s96_s13, %s224_s0 }
   0x6   :  { %p102_p2 = pnand %p100_p1, %p97_p0 }
   0x8   :  { %105 = shalt.err (!%p102_p2)
}
   0x9   :  { %s106_s18 = scalar_lea.vmem %s16_s10, 256  ;;  %p111_p4 = scmp.lt.s32.totalorder %s16_s10, %s16_s10 }
   0xa   :  { %p107_p3 = scmp.ne.s32.totalorder %s16_s10, %s106_s18  ;;  %p112_p5 = scmp.lt.s32.totalorder %s106_s18, %s106_s18 }
   0xc   :  { %p113_p6 = por %p112_p5, %p111_p4 }
   0xe   :  { %p114_p7 = pnand %p113_p6, %p107_p3 }
  0x10   :  { %117 = shalt.err (!%p114_p7)
}
  0x11   :  { %s169_s19 = smov 128   ;;  %s170_s20 = smov 8  }
  0x12   :  { %21 = dma.hbm_to_vmem [thread:$0]  %s224_s0, 256, %s16_s10, [#allocation4], %s169_s19, %s169_s19, %s170_s20  }
  0x13   :  { %s171_s23 = smov [#allocation6]   ;;  %s118_s27 = scalar_lea.hbm %s225_s1, 256 }
  0x14   :  { %s27_s24 = sshll.u32 %s171_s23, 4  ;;  %p119_p8 = scmp.ne.s32.totalorder %s225_s1, %s118_s27  ;;  %s28_s24 = int_to_ptr.vmem [resolvable:$true] %s27_s24 }
  0x15   :  { %p122_p9 = scmp.lt.u32.totalorder %s118_s27, %s225_s1 }
  0x17   :  { %p124_p10 = pnand %p122_p9, %p119_p8 }
  0x19   :  { %127 = shalt.err (!%p124_p10)
}
  0x1a   :  { %s128_s4 = scalar_lea.vmem %s28_s24, 256  ;;  %p133_p12 = scmp.lt.s32.totalorder %s28_s24, %s28_s24 }
  0x1b   :  { %p129_p11 = scmp.ne.s32.totalorder %s28_s24, %s128_s4  ;;  %p134_p13 = scmp.lt.s32.totalorder %s128_s4, %s128_s4 }
  0x1d   :  { %p135_p0 = por %p134_p13, %p133_p12 }
  0x1f   :  { %p136_p1 = pnand %p135_p0, %p129_p11 }
  0x21   :  { %139 = shalt.err (!%p136_p1)
}
  0x22   :  { %33 = dma.hbm_to_vmem [thread:$0]  %s225_s1, 256, %s28_s24, [#allocation7], %s169_s19, %s169_s19, %s170_s20  }
  0x23   :  { %162 = dma.done.wait [#allocation4], 256  }
  0x24   :  { %163 = vsyncadd [#allocation4], 4294967040 }
  0x25   :  { %164 = dma.done.wait [#allocation7], 256  }
  0x26   :  { %165 = vsyncadd [#allocation7], 4294967040  ;;  %v45_v0 = vld [vmem:[#allocation6] sm:$0xff]  ;;  %v46_v1 = vld [vmem:[#allocation6 + $0x8] sm:$0xff]  ;;  %s172_s1 = smov [#allocation8]   ;;  %vm71_vm0 = vcmask 0  }
  0x27   :  { %v47_v2 = vld [vmem:[#allocation3] sm:$0xff]  ;;  %v48_v3 = vld [vmem:[#allocation3 + $0x8] sm:$0xff]  ;;  %s79_s6 = sshll.u32 %s172_s1, 4  ;;  %s80_s6 = int_to_ptr.vmem [resolvable:$true] %s79_s6 }
  0x28   :  { %v49_v4 = vsub.f32 %v45_v0, %v47_v2  ;;  %v50_v5 = vsub.f32 %v46_v1, %v48_v3  ;;  %s140_s8 = scalar_lea.vmem %s80_s6, 16  ;;  %s144_s9 = scalar_lea.vmem %s80_s6, 32 }
  0x29   :  { %p141_p2 = scmp.ne.s32.totalorder %s80_s6, %s140_s8  ;;  %p145_p3 = scmp.lt.s32.totalorder %s80_s6, %s80_s6 }
  0x2a   :  { %v51_v6 = vmul.f32 %v49_v4, %v49_v4  ;;  %v52_v7 = vmul.f32 %v50_v5, %v50_v5  ;;  %p146_p4 = scmp.lt.s32.totalorder %s144_s9, %s140_s8 }
  0x2c   :  { %v54_v8 = vadd.f32 %v52_v7, %v51_v6  ;;  %p147_p5 = por %p146_p4, %p145_p3 }
  0x2e   :  { %61 = vadd.xlane.f32.xlu0 %v54_v8  ;;  %p148_p6 = pnand %p147_p5, %p141_p2 }
  0xbb   :  { %v62_v9 = vpop.xlane.xlu0 %61 }
  0xbc   :  { %v63_v10 = vrot.slane %v62_v9, 4 }
  0xbe   :  { %v64_v11 = vadd.f32 %v63_v10, %v62_v9 }
  0xc0   :  { %v65_v12 = vrot.slane %v64_v11, 2 }
  0xc2   :  { %v66_v13 = vadd.f32 %v65_v12, %v64_v11 }
  0xc4   :  { %v67_v14 = vrot.slane %v66_v13, 1 }
  0xc6   :  { %v68_v15 = vadd.f32 %v67_v14, %v66_v13 }
  0xc8   :  { %89 = vpush %v68_v15 }
  0xf9   :  { %s90_s7 = spop %89 }
  0xfa   :  { %v70_v16 = vstv %s90_s7 }
  0xfb   :  { %72 = vst.msk [vmem:[#allocation8] sm:$0x1] %vm71_vm0, %v70_v16 }
  0xfc   :  { %151 = shalt.err (!%p148_p6)
}
  0xfd   :  { %s152_s12 = scalar_lea.hbm %s226_s2, 16 }
  0xfe   :  { %p153_p7 = scmp.ne.s32.totalorder %s226_s2, %s152_s12  ;;  %p156_p8 = scmp.lt.u32.totalorder %s152_s12, %s226_s2 }
 0x100   :  { %p158_p9 = pnand %p156_p8, %p153_p7 }
 0x102   :  { %161 = shalt.err (!%p158_p9)
}
 0x103   :  { %82 = dma.vmem_to_hbm [thread:$0]  %s80_s6, 16, %s226_s2, [#allocation5]  }
 0x104   :  { %166 = dma.done.wait [#allocation5], 16  }
 0x105   :  { %167 = vsyncadd [#allocation5], 4294967280 }
 0x106   :  { %86 = vsyncpa [#allocation4], 1 }
 0x107   :  { %87 = vsyncpa [#allocation7], 1 }
 0x108   :  { %88 = vsyncpa [#allocation5], 1 }

</bundles_post_ra>
